<compile_context>
chip_gen: v5e
topology: v5e:2x2
jax: 0.10.0
libtpu: 0.0.40
codegen_flags: <defaults>
</compile_context>

<pallas_src>
import functools

import jax
import jax.numpy as jnp
from jax.experimental import pallas as pl
from jax.experimental.pallas import tpu as pltpu

LANE = 128  # TPU lane width; hidden/out features are padded to this.


def _round_up(x, m):
    return ((x + m - 1) // m) * m


def _cdiv(a, b):
    return (a + b - 1) // b


# --------------------------------------------------------------------------
# Kernel: fused (Linear+BN-fold) -> ReLU  x3, then output Linear.
# Operands: bf16 z tile, 4 bf16 weight slabs (VMEM-resident), packed (4,128)
# f32 bias. Output tile is bf16, 128-lane dense.
# --------------------------------------------------------------------------
def _decoder_kernel(z_ref, w1_ref, w2_ref, w3_ref, w4_ref, b_ref, out_ref):
    x = z_ref[...]                       # already bf16 (host-side cast)
    b = b_ref[...]                       # (4, LANE) float32, BN folded in rows 0..2

    h = jnp.dot(x, w1_ref[...], preferred_element_type=jnp.float32) + b[0:1, :]
    h = jnp.maximum(h, 0.0).astype(jnp.bfloat16)

    h = jnp.dot(h, w2_ref[...], preferred_element_type=jnp.float32) + b[1:2, :]
    h = jnp.maximum(h, 0.0).astype(jnp.bfloat16)

    h = jnp.dot(h, w3_ref[...], preferred_element_type=jnp.float32) + b[2:3, :]
    h = jnp.maximum(h, 0.0).astype(jnp.bfloat16)

    y = jnp.dot(h, w4_ref[...], preferred_element_type=jnp.float32) + b[3:4, :]
    out_ref[...] = y.astype(out_ref.dtype)


# --------------------------------------------------------------------------
# Tiling policy.
# --------------------------------------------------------------------------
def _choose_tiling(batch, block_m):
    """Pick (tm, n_steps, B_pad) such that
         * tm is a multiple of 8 and tm <= ~block_m,
         * the grid has >= 2 steps whenever the batch allows it (v7x megacore),
         * dead padded rows are at most 8*(n_steps-1) (never a full extra tile).
    """
    b8 = _round_up(batch, 8)
    if b8 >= 16:
        n_steps = max(2, _cdiv(b8, block_m))
        tm = _round_up(_cdiv(b8, n_steps), 8)
        n_steps = _cdiv(b8, tm)
    else:
        tm, n_steps = b8, 1
    return tm, n_steps, tm * n_steps


# --------------------------------------------------------------------------
# Wrapper: batch-tiled pallas_call with VMEM-resident weights.
# --------------------------------------------------------------------------
@functools.partial(jax.jit, static_argnames=("out_dim", "block_m"))
def decoder_forward(z, params, *, out_dim, block_m=2048):
    """z: (B, latent) f32 (or bf16).  params: packed params (pack_kernel_params).

    Returns (B, out_dim) bf16.
    """
    B, L = z.shape
    tm, n_steps, B_pad = _choose_tiling(B, block_m)

    z = z.astype(jnp.bfloat16)                    # host-side cast: halves input DMA
    if B_pad != B:
        z = jnp.pad(z, ((0, B_pad - B), (0, 0)))

    out_pad = pl.pallas_call(
        _decoder_kernel,
        out_shape=jax.ShapeDtypeStruct((B_pad, LANE), jnp.bfloat16),
        grid=(n_steps,),
        in_specs=[
            pl.BlockSpec((tm, L), lambda i: (i, 0)),        # z tile, marches over batch
            pl.BlockSpec((L, LANE), lambda i: (0, 0)),      # w1  (resident)
            pl.BlockSpec((LANE, LANE), lambda i: (0, 0)),   # w2  (resident)
            pl.BlockSpec((LANE, LANE), lambda i: (0, 0)),   # w3  (resident)
            pl.BlockSpec((LANE, LANE), lambda i: (0, 0)),   # w4  (resident)
            pl.BlockSpec((4, LANE), lambda i: (0, 0)),      # packed biases (resident)
        ],
        # Note: out writeback is the only large per-step DMA; pl.Buffered(3)
        # on this spec is an optional further tweak if profiles show it exposed.
        out_specs=pl.BlockSpec((tm, LANE), lambda i: (i, 0)),
        compiler_params=pltpu.CompilerParams(
            dimension_semantics=("parallel",),              # megacore on v7x
            vmem_limit_bytes=32 << 20,                      # safe for big tm on v5e
        ),
    )(z, params["w1"], params["w2"], params["w3"], params["w4"], params["b"])

    return out_pad[:B, :out_dim]


# --------------------------------------------------------------------------
# Parameter construction / packing.
# --------------------------------------------------------------------------
def init_raw_params(key, latent_dim, hidden_dim, out_dim):
    """Synthetic parameters matching the PyTorch module (torch layouts)."""
    dims = [(latent_dim, hidden_dim),
            (hidden_dim, hidden_dim),
            (hidden_dim, hidden_dim),
            (hidden_dim, out_dim)]
    raw = {}
    keys = jax.random.split(key, 4 * 2 + 3 * 4)
    ki = 0
    for li, (din, dout) in enumerate(dims, start=1):
        bound = 1.0 / jnp.sqrt(din)
        raw[f"w{li}"] = jax.random.uniform(keys[ki], (dout, din), jnp.float32,
                                           -bound, bound); ki += 1          # torch (out, in)
        raw[f"b{li}"] = jax.random.uniform(keys[ki], (dout,), jnp.float32,
                                           -bound, bound); ki += 1
        if li <= 3:  # BN follows the first three Linears only
            raw[f"gamma{li}"] = 1.0 + 0.01 * jax.random.normal(keys[ki], (dout,), jnp.float32); ki += 1
            raw[f"beta{li}"] = 0.01 * jax.random.normal(keys[ki], (dout,), jnp.float32); ki += 1
            raw[f"mean{li}"] = 0.01 * jax.random.normal(keys[ki], (dout,), jnp.float32); ki += 1
            raw[f"var{li}"] = 1.0 + 0.1 * jax.random.uniform(keys[ki], (dout,), jnp.float32); ki += 1
    return raw


def pack_kernel_params(raw, latent_dim, hidden_dim, out_dim, eps=1e-5):
    """Fold BN into Linear, pad features to 128 lanes, transpose to (in,out),
    cast weights to bf16, pack biases into one (4, 128) f32 operand."""
    hid_p = _round_up(hidden_dim, LANE)
    out_p = _round_up(out_dim, LANE)
    assert hid_p == out_p == LANE, "this packing assumes hidden/out fit one lane slab"

    in_dims = [latent_dim, hidden_dim, hidden_dim, hidden_dim]
    in_pads = [latent_dim, hid_p, hid_p, hid_p]
    out_dims = [hidden_dim, hidden_dim, hidden_dim, out_dim]
    out_pads = [hid_p, hid_p, hid_p, out_p]

    params = {}
    b_rows = []
    for li in range(4):
        w = raw[f"w{li + 1}"].T.astype(jnp.float32)   # (in, out)
        b = raw[f"b{li + 1}"].astype(jnp.float32)
        if li < 3:  # fold eval-mode BatchNorm: y = (xW+b)*s + t
            s = raw[f"gamma{li + 1}"] / jnp.sqrt(raw[f"var{li + 1}"] + eps)
            t = raw[f"beta{li + 1}"] - raw[f"mean{li + 1}"] * s
            w = w * s[None, :]
            b = b * s + t
        wp = jnp.zeros((in_pads[li], out_pads[li]), jnp.float32)
        wp = wp.at[:in_dims[li], :out_dims[li]].set(w)
        bp = jnp.zeros((LANE,), jnp.float32).at[:out_dims[li]].set(b)
        params[f"w{li + 1}"] = wp.astype(jnp.bfloat16)
        b_rows.append(bp)
    params["b"] = jnp.stack(b_rows, axis=0)           # (4, 128) f32
    return params


# --------------------------------------------------------------------------
# References.
# --------------------------------------------------------------------------
def quantized_reference(z, packed, out_dim):
    """Matches the kernel's bf16-operand / f32-accumulate path (f32 final output)."""
    x = z.astype(jnp.bfloat16).astype(jnp.float32)
    b = packed["b"]
    for li in range(3):
        w = packed[f"w{li + 1}"].astype(jnp.float32)
        x = jnp.maximum(x @ w + b[li][None, :], 0.0)
        x = x.astype(jnp.bfloat16).astype(jnp.float32)
    y = x @ packed["w4"].astype(jnp.float32) + b[3][None, :]
    return y[:, :out_dim]


def reference_eval(z, raw, eps=1e-5):
    """Full-f32 PyTorch eval-mode reference (BN with running stats, dropout=identity)."""
    h = z
    for li in range(1, 4):
        h = h @ raw[f"w{li}"].T + raw[f"b{li}"]
        s = raw[f"gamma{li}"] / jnp.sqrt(raw[f"var{li}"] + eps)
        t = raw[f"beta{li}"] - raw[f"mean{li}"] * s
        h = jnp.maximum(h * s + t, 0.0)
    return h @ raw["w4"].T + raw["b4"]


if __name__ == "__main__":
    # cfg: latent_dim=32, decoder_hidden_dim=64,
    #      first_modality_dim=40, second_modality_dim=24, batch_norm=True,
    #      dropout_rate=0.1 (identity at inference).
    LATENT = 32
    HIDDEN = 64
    OUT = 40 + 24
    BATCH = 8

    key = jax.random.PRNGKey(0)
    kz, kp = jax.random.split(key)
    z = jax.random.normal(kz, (BATCH, LATENT), jnp.float32)

    raw = init_raw_params(kp, LATENT, HIDDEN, OUT)
    packed = pack_kernel_params(raw, LATENT, HIDDEN, OUT)

    out = decoder_forward(z, packed, out_dim=OUT)
    out = jax.block_until_ready(out)
    assert out.shape == (BATCH, OUT), out.shape
    out_f32 = out.astype(jnp.float32)

    # Check against a reference that uses the same bf16-rounded, BN-folded
    # operands (kernel output is bf16 -> tolerance covers the final cast).
    qref = quantized_reference(z, packed, OUT)
    assert jnp.allclose(out_f32, qref, atol=3e-2, rtol=3e-2), "mismatch vs quantized reference"

    # Loose sanity check against the full-precision PyTorch-eval reference.
    fref = reference_eval(z, raw)
    assert float(jnp.max(jnp.abs(out_f32 - fref))) < 1e-1, "drift vs f32 reference too large"

    # Exercise the multi-step grid + odd-batch padding path (tiny block_m so the
    # small example still produces several grid steps, including a padded tail).
    BATCH2 = 300
    z2 = jax.random.normal(jax.random.PRNGKey(1), (BATCH2, LATENT), jnp.float32)
    out2 = jax.block_until_ready(decoder_forward(z2, packed, out_dim=OUT, block_m=64))
    assert out2.shape == (BATCH2, OUT), out2.shape
    qref2 = quantized_reference(z2, packed, OUT)
    assert jnp.allclose(out2.astype(jnp.float32), qref2, atol=3e-2, rtol=3e-2), \
        "mismatch vs quantized reference (multi-tile path)"

    print("KERNEL_OK")
</pallas_src>

<mosaic_0001>
module attributes {stable_mosaic.version = 11 : i64} {
  func.func @_decoder_kernel(%arg0: i32, %arg1: memref<8x32xbf16, #tpu.memory_space<vmem>>, %arg2: memref<32x128xbf16, #tpu.memory_space<vmem>>, %arg3: memref<128x128xbf16, #tpu.memory_space<vmem>>, %arg4: memref<128x128xbf16, #tpu.memory_space<vmem>>, %arg5: memref<128x128xbf16, #tpu.memory_space<vmem>>, %arg6: memref<4x128xf32, #tpu.memory_space<vmem>>, %arg7: memref<8x128xbf16, #tpu.memory_space<vmem>>) attributes {dimension_semantics = [#tpu.dimension_semantics<parallel>], iteration_bounds = array<i64: 1>, scalar_prefetch = 0 : i64, scratch_operands = 0 : i64, tpu.core_type = #tpu.core_type<tc>, window_params = [{transform_indices = @transform_0, window_bounds = array<i64: 8, 32>}, {pipeline_mode = #tpu.pipeline_mode<synchronous>, transform_indices = @transform_1, window_bounds = array<i64: 32, 128>}, {pipeline_mode = #tpu.pipeline_mode<synchronous>, transform_indices = @transform_2, window_bounds = array<i64: 128, 128>}, {pipeline_mode = #tpu.pipeline_mode<synchronous>, transform_indices = @transform_3, window_bounds = array<i64: 128, 128>}, {pipeline_mode = #tpu.pipeline_mode<synchronous>, transform_indices = @transform_4, window_bounds = array<i64: 128, 128>}, {pipeline_mode = #tpu.pipeline_mode<synchronous>, transform_indices = @transform_5, window_bounds = array<i64: 4, 128>}, {transform_indices = @transform_6, window_bounds = array<i64: 8, 128>}]} {
    %c0 = arith.constant 0 : index
    %c0_0 = arith.constant 0 : index
    %0 = vector.load %arg1[%c0, %c0_0] : memref<8x32xbf16, #tpu.memory_space<vmem>>, vector<8x32xbf16>
    %c0_1 = arith.constant 0 : index
    %c0_2 = arith.constant 0 : index
    %1 = vector.load %arg6[%c0_1, %c0_2] : memref<4x128xf32, #tpu.memory_space<vmem>>, vector<4x128xf32>
    %c0_3 = arith.constant 0 : index
    %c0_4 = arith.constant 0 : index
    %2 = vector.load %arg2[%c0_3, %c0_4] : memref<32x128xbf16, #tpu.memory_space<vmem>>, vector<32x128xbf16>
    %cst = arith.constant dense<0.000000e+00> : vector<8x128xf32>
    %3 = tpu.matmul %0, %2, %cst {dimension_numbers = #tpu.dot_dimension_numbers<[1], [0], [0], [1], [0, 0, 1, 1], [], []>} : vector<8x32xbf16>, vector<32x128xbf16>, vector<8x128xf32> -> vector<8x128xf32>
    %4 = vector.extract_strided_slice %1 {offsets = [0, 0], sizes = [1, 128], strides = [1, 1]} : vector<4x128xf32> to vector<1x128xf32>
    %5 = vector.broadcast %4 : vector<1x128xf32> to vector<8x128xf32>
    %6 = arith.addf %3, %5 : vector<8x128xf32>
    %cst_5 = arith.constant 0.000000e+00 : f32
    %7 = vector.broadcast %cst_5 : f32 to vector<8x128xf32>
    %8 = arith.maximumf %6, %7 : vector<8x128xf32>
    %9 = arith.truncf %8 : vector<8x128xf32> to vector<8x128xbf16>
    %c0_6 = arith.constant 0 : index
    %c0_7 = arith.constant 0 : index
    %10 = vector.load %arg3[%c0_6, %c0_7] : memref<128x128xbf16, #tpu.memory_space<vmem>>, vector<128x128xbf16>
    %cst_8 = arith.constant dense<0.000000e+00> : vector<8x128xf32>
    %11 = tpu.matmul %9, %10, %cst_8 {dimension_numbers = #tpu.dot_dimension_numbers<[1], [0], [0], [1], [0, 0, 1, 1], [], []>} : vector<8x128xbf16>, vector<128x128xbf16>, vector<8x128xf32> -> vector<8x128xf32>
    %12 = vector.extract_strided_slice %1 {offsets = [1, 0], sizes = [1, 128], strides = [1, 1]} : vector<4x128xf32> to vector<1x128xf32>
    %13 = vector.broadcast %12 : vector<1x128xf32> to vector<8x128xf32>
    %14 = arith.addf %11, %13 : vector<8x128xf32>
    %cst_9 = arith.constant 0.000000e+00 : f32
    %15 = vector.broadcast %cst_9 : f32 to vector<8x128xf32>
    %16 = arith.maximumf %14, %15 : vector<8x128xf32>
    %17 = arith.truncf %16 : vector<8x128xf32> to vector<8x128xbf16>
    %c0_10 = arith.constant 0 : index
    %c0_11 = arith.constant 0 : index
    %18 = vector.load %arg4[%c0_10, %c0_11] : memref<128x128xbf16, #tpu.memory_space<vmem>>, vector<128x128xbf16>
    %cst_12 = arith.constant dense<0.000000e+00> : vector<8x128xf32>
    %19 = tpu.matmul %17, %18, %cst_12 {dimension_numbers = #tpu.dot_dimension_numbers<[1], [0], [0], [1], [0, 0, 1, 1], [], []>} : vector<8x128xbf16>, vector<128x128xbf16>, vector<8x128xf32> -> vector<8x128xf32>
    %20 = vector.extract_strided_slice %1 {offsets = [2, 0], sizes = [1, 128], strides = [1, 1]} : vector<4x128xf32> to vector<1x128xf32>
    %21 = vector.broadcast %20 : vector<1x128xf32> to vector<8x128xf32>
    %22 = arith.addf %19, %21 : vector<8x128xf32>
    %cst_13 = arith.constant 0.000000e+00 : f32
    %23 = vector.broadcast %cst_13 : f32 to vector<8x128xf32>
    %24 = arith.maximumf %22, %23 : vector<8x128xf32>
    %25 = arith.truncf %24 : vector<8x128xf32> to vector<8x128xbf16>
    %c0_14 = arith.constant 0 : index
    %c0_15 = arith.constant 0 : index
    %26 = vector.load %arg5[%c0_14, %c0_15] : memref<128x128xbf16, #tpu.memory_space<vmem>>, vector<128x128xbf16>
    %cst_16 = arith.constant dense<0.000000e+00> : vector<8x128xf32>
    %27 = tpu.matmul %25, %26, %cst_16 {dimension_numbers = #tpu.dot_dimension_numbers<[1], [0], [0], [1], [0, 0, 1, 1], [], []>} : vector<8x128xbf16>, vector<128x128xbf16>, vector<8x128xf32> -> vector<8x128xf32>
    %28 = vector.extract_strided_slice %1 {offsets = [3, 0], sizes = [1, 128], strides = [1, 1]} : vector<4x128xf32> to vector<1x128xf32>
    %29 = vector.broadcast %28 : vector<1x128xf32> to vector<8x128xf32>
    %30 = arith.addf %27, %29 : vector<8x128xf32>
    %31 = arith.truncf %30 : vector<8x128xf32> to vector<8x128xbf16>
    %c0_17 = arith.constant 0 : index
    %c0_18 = arith.constant 0 : index
    %32 = vector.load %arg7[%c0_17, %c0_18] : memref<8x128xbf16, #tpu.memory_space<vmem>>, vector<8x128xbf16>
    tpu.vector_store %arg7[%c0_17, %c0_18], %31 {strides = array<i32>} : memref<8x128xbf16, #tpu.memory_space<vmem>>, vector<8x128xbf16>,
    return
  }
  func.func @transform_0(%arg0: i32) -> (i32, i32) {
    %c0_i32 = arith.constant 0 : i32
    %c0_i32_0 = arith.constant 0 : i32
    return %arg0, %c0_i32 : i32, i32
  }
  func.func @transform_1(%arg0: i32) -> (i32, i32) {
    %c0_i32 = arith.constant 0 : i32
    %c0_i32_0 = arith.constant 0 : i32
    %c0_i32_1 = arith.constant 0 : i32
    return %c0_i32, %c0_i32_0 : i32, i32
  }
  func.func @transform_2(%arg0: i32) -> (i32, i32) {
    %c0_i32 = arith.constant 0 : i32
    %c0_i32_0 = arith.constant 0 : i32
    %c0_i32_1 = arith.constant 0 : i32
    return %c0_i32, %c0_i32_0 : i32, i32
  }
  func.func @transform_3(%arg0: i32) -> (i32, i32) {
    %c0_i32 = arith.constant 0 : i32
    %c0_i32_0 = arith.constant 0 : i32
    %c0_i32_1 = arith.constant 0 : i32
    return %c0_i32, %c0_i32_0 : i32, i32
  }
  func.func @transform_4(%arg0: i32) -> (i32, i32) {
    %c0_i32 = arith.constant 0 : i32
    %c0_i32_0 = arith.constant 0 : i32
    %c0_i32_1 = arith.constant 0 : i32
    return %c0_i32, %c0_i32_0 : i32, i32
  }
  func.func @transform_5(%arg0: i32) -> (i32, i32) {
    %c0_i32 = arith.constant 0 : i32
    %c0_i32_0 = arith.constant 0 : i32
    %c0_i32_1 = arith.constant 0 : i32
    return %c0_i32, %c0_i32_0 : i32, i32
  }
  func.func @transform_6(%arg0: i32) -> (i32, i32) {
    %c0_i32 = arith.constant 0 : i32
    %c0_i32_0 = arith.constant 0 : i32
    return %arg0, %c0_i32 : i32, i32
  }
}

</mosaic_0001>

<bundles_post_ra>
// kernel: decoder_forward.1
= control target key start
LH: loop header
LB: loop body
LE: loop exit
PB: predicated region body
PF: predicated region fallthrough
CT: control target
= control target key end

     0   :  { %11 = vsyncpa [#allocation3], 0  ;;  %s714_s0 = inlined_call_operand.vmem [shape: bf16[8,32], index: 0, kind: input, shape index: {}]   ;;  %s715_s1 = inlined_call_operand.hbm [shape: bf16[32,128], index: 1, kind: input, shape index: {}]   ;;  %s716_s2 = inlined_call_operand.hbm [shape: bf16[128,128], index: 2, kind: input, shape index: {}]   ;;  %s717_s3 = inlined_call_operand.hbm [shape: bf16[128,128], index: 3, kind: input, shape index: {}]   ;;  %s718_s4 = inlined_call_operand.hbm [shape: bf16[128,128], index: 4, kind: input, shape index: {}]   ;;  %s719_s5 = inlined_call_operand.vmem [shape: f32[4,128], index: 5, kind: input, shape index: {}]   ;;  %s720_s6 = inlined_call_operand.hbm [shape: bf16[8,128], index: 6, kind: output, shape index: {}]  }
   0x1   :  { %12 = vsyncpa [#allocation6], 0 }
   0x2   :  { %13 = vsyncpa [#allocation9], 0 }
   0x3   :  { %14 = vsyncpa [#allocation4], 0  ;;  %s34_s23 = sshll.u32 %s716_s2, 4  ;;  %s651_s24 = smov [#allocation5]   ;;  %s35_s23 = int_to_ptr.hbm [resolvable:$true] %s34_s23 }
   0x4   :  { %s36_s25 = sshll.u32 %s651_s24, 4  ;;  %s21_s28 = sshll.u32 %s715_s1, 4  ;;  %s37_s25 = int_to_ptr.vmem [resolvable:$true] %s36_s25  ;;  %s22_s28 = int_to_ptr.hbm [resolvable:$true] %s21_s28 }
   0x5   :  { %s652_s29 = smov 64   ;;  %s653_s30 = smov 4  }
   0x6   :  { %42 = dma.hbm_to_vmem [thread:$0]  %s35_s23, 1024, %s37_s25, [#allocation6], %s652_s29, %s652_s29, %s653_s30  }
   0x7   :  { %s654_s7 = smov [#allocation2]   ;;  %s47_s11 = sshll.u32 %s717_s3, 4  ;;  %s48_s11 = int_to_ptr.hbm [resolvable:$true] %s47_s11 }
   0x8   :  { %s23_s8 = sshll.u32 %s654_s7, 4  ;;  %s60_s13 = sshll.u32 %s718_s4, 4  ;;  %s24_s8 = int_to_ptr.vmem [resolvable:$true] %s23_s8  ;;  %s61_s13 = int_to_ptr.hbm [resolvable:$true] %s60_s13 }
   0x9   :  { %29 = dma.hbm_to_vmem [thread:$0]  %s22_s28, 256, %s24_s8, [#allocation3], %s652_s29, %s652_s29, %s653_s30  }
   0xa   :  { %s655_s14 = smov [#allocation7]   ;;  %s656_s1 = smov [#allocation8]  }
   0xb   :  { %s49_s15 = sshll.u32 %s655_s14, 4  ;;  %s62_s16 = sshll.u32 %s656_s1, 4  ;;  %s50_s15 = int_to_ptr.vmem [resolvable:$true] %s49_s15  ;;  %s63_s16 = int_to_ptr.vmem [resolvable:$true] %s62_s16 }
   0xc   :  { %55 = dma.hbm_to_vmem [thread:$0]  %s48_s11, 1024, %s50_s15, [#allocation6], %s652_s29, %s652_s29, %s653_s30  }
   0xd   :  { %68 = dma.hbm_to_vmem [thread:$0]  %s61_s13, 1024, %s63_s16, [#allocation9], %s652_s29, %s652_s29, %s653_s30  }
   0xe   :  { %643 = dma.done.wait [#allocation3], 256  }
   0xf   :  { %644 = vsyncadd [#allocation3], 4294967040 }
  0x10   :  { %645 = dma.done.wait [#allocation6], 2048  }
  0x11   :  { %646 = vsyncadd [#allocation6], 4294965248 }
  0x12   :  { %647 = dma.done.wait [#allocation9], 1024  }
  0x13   :  { %648 = vsyncadd [#allocation9], 4294966272  ;;  %v491_v0 = vld [vmem:[#allocation2 + $0x8] sm:$0xff]  ;;  %v490_v2 = vld [vmem:[#allocation2] sm:$0xff]  ;;  %vm107_vm0 = vcmask 261120   ;;  %s373_s21 = sshll.u32 %s720_s6, 4  ;;  %s374_s21 = int_to_ptr.hbm [resolvable:$true] %s373_s21 }
  0x14   :  { %v499_v1 = vld [vmem:[#allocation5 + $0x38] sm:$0xff]  ;;  %117 = vmatpush.bf16.msra.mxu0 %v491_v0  ;;  %v498_v3 = vld [vmem:[#allocation5 + $0x30] sm:$0xff]  ;;  %v497_v5 = vld [vmem:[#allocation5 + $0x28] sm:$0xff] }
  0x15   :  { %191 = vmatpush.bf16.msra.mxu1 %v499_v1  ;;  %v88_v4 = vld [vmem:[%s714_s0] sm:$0xf]  ;;  %v496_v6 = vld [vmem:[#allocation5 + $0x20] sm:$0xff]  ;;  %v495_v7 = vld [vmem:[#allocation5 + $0x18] sm:$0xff] }
  0x16   :  { %v494_v8 = vld [vmem:[#allocation5 + $0x10] sm:$0xff]  ;;  %v493_v9 = vld [vmem:[#allocation5 + $0x8] sm:$0xff]  ;;  %v492_v10 = vld [vmem:[#allocation5] sm:$0xff] }
  0x17   :  { %v507_v11 = vld [vmem:[#allocation7 + $0x38] sm:$0xff]  ;;  %v506_v12 = vld [vmem:[#allocation7 + $0x30] sm:$0xff]  ;;  %v505_v13 = vld [vmem:[#allocation7 + $0x28] sm:$0xff] }
  0x18   :  { %118 = vmatpush.bf16.msra.mxu0 %v490_v2  ;;  %271 = vmatpush.bf16.msra.mxu2 %v507_v11  ;;  %v504_v14 = vld [vmem:[#allocation7 + $0x20] sm:$0xff]  ;;  %v503_v15 = vld [vmem:[#allocation7 + $0x18] sm:$0xff]  ;;  %v89_v16 = vld [vmem:[%s719_s5] sm:$0xf]  ;;  %s657_s5 = smov [#allocation10]  }
  0x19   :  { %192 = vmatpush.bf16.msra.mxu1 %v498_v3  ;;  %v502_v17 = vld [vmem:[#allocation7 + $0x10] sm:$0xff]  ;;  %v94_v18 = vperm.slane %v89_v16, 0  ;;  %v501_v24 = vld [vmem:[#allocation7 + $0x8] sm:$0xff]  ;;  %v500_v25 = vld [vmem:[#allocation7] sm:$0xff]  ;;  %v142_v32 = vperm.slane %v89_v16, 1  ;;  %v222_v40 = vperm.slane %v89_v16, 2 }
  0x1a   :  { %v515_v26 = vld [vmem:[#allocation8 + $0x38] sm:$0xff]  ;;  %v514_v27 = vld [vmem:[#allocation8 + $0x30] sm:$0xff]  ;;  %v513_v28 = vld [vmem:[#allocation8 + $0x28] sm:$0xff]  ;;  %v302_v46 = vperm.slane %v89_v16, 3  ;;  %s371_s18 = sshll.u32 %s657_s5, 4  ;;  %s372_s18 = int_to_ptr.vmem [resolvable:$true] %s371_s18 }
  0x1b   :  { %393 = vmatmul.msk.bf16.vlgmr.msra.gmra.mxu0 %vm107_vm0, %v88_v4  ;;  %351 = vmatpush.bf16.msra.mxu3 %v515_v26  ;;  %v512_v29 = vld [vmem:[#allocation8 + $0x20] sm:$0xff]  ;;  %v511_v30 = vld [vmem:[#allocation8 + $0x18] sm:$0xff]  ;;  %v510_v31 = vld [vmem:[#allocation8 + $0x10] sm:$0xff] }
  0x1c   :  { %272 = vmatpush.bf16.msra.mxu2 %v506_v12  ;;  %v509_v38 = vld [vmem:[#allocation8 + $0x8] sm:$0xff]  ;;  %v508_v39 = vld [vmem:[#allocation8] sm:$0xff] }
  0x1d   :  { %193 = vmatpush.bf16.msra.mxu1 %v497_v5 }
  0x1f   :  { %352 = vmatpush.bf16.msra.mxu3 %v514_v27 }
  0x20   :  { %273 = vmatpush.bf16.msra.mxu2 %v505_v13 }
  0x21   :  { %194 = vmatpush.bf16.msra.mxu1 %v496_v6 }
  0x23   :  { %353 = vmatpush.bf16.msra.mxu3 %v513_v28 }
  0x24   :  { %274 = vmatpush.bf16.msra.mxu2 %v504_v14 }
  0x25   :  { %195 = vmatpush.bf16.msra.mxu1 %v495_v7 }
  0x27   :  { %354 = vmatpush.bf16.msra.mxu3 %v512_v29 }
  0x28   :  { %275 = vmatpush.bf16.msra.mxu2 %v503_v15 }
  0x29   :  { %196 = vmatpush.bf16.msra.mxu1 %v494_v8 }
  0x2b   :  { %355 = vmatpush.bf16.msra.mxu3 %v511_v30 }
  0x2c   :  { %276 = vmatpush.bf16.msra.mxu2 %v502_v17 }
  0x2d   :  { %197 = vmatpush.bf16.msra.mxu1 %v493_v9 }
  0x2f   :  { %356 = vmatpush.bf16.msra.mxu3 %v510_v31 }
  0x30   :  { %277 = vmatpush.bf16.msra.mxu2 %v501_v24 }
  0x31   :  { %198 = vmatpush.bf16.msra.mxu1 %v492_v10 }
  0x33   :  { %357 = vmatpush.bf16.msra.mxu3 %v509_v38 }
  0x34   :  { %278 = vmatpush.bf16.msra.mxu2 %v500_v25 }
  0x37   :  { %358 = vmatpush.bf16.msra.mxu3 %v508_v39 }
  0x98   :  { %v120_v19 = vpop.f32.mrf.mxu0 }
  0x99   :  { %v121_v20 = vadd.f32 %v120_v19, %v94_v18 }
  0x9b   :  { %v124_v21 = vmax.f32 %v121_v20, 0.0 }
  0x9d   :  { %v125_v22 = vpack.c.bf16 %v124_v21, %v124_v21 }
  0x9f   :  { %199 = vmatmul.bf16.vlgmr.msra.gmra.mxu1 %v125_v22 }
  0xa0   :  { %v122_v23 = vpop.f32.mrf.mxu0 }
 0x11c   :  { %v200_v33 = vpop.f32.mrf.mxu1 }
 0x11d   :  { %v201_v34 = vadd.f32 %v200_v33, %v142_v32 }
 0x11f   :  { %v204_v35 = vmax.f32 %v201_v34, 0.0 }
 0x121   :  { %v205_v36 = vpack.c.bf16 %v204_v35, %v204_v35 }
 0x123   :  { %279 = vmatmul.bf16.vlgmr.msra.gmra.mxu2 %v205_v36 }
 0x124   :  { %v202_v37 = vpop.f32.mrf.mxu1 }
 0x1a6   :  { %v280_v41 = vpop.f32.mrf.mxu2 }
 0x1a7   :  { %v281_v42 = vadd.f32 %v280_v41, %v222_v40 }
 0x1a9   :  { %v284_v43 = vmax.f32 %v281_v42, 0.0 }
 0x1ab   :  { %v285_v44 = vpack.c.bf16 %v284_v43, %v284_v43 }
 0x1ad   :  { %359 = vmatmul.bf16.vlgmr.msra.gmra.mxu3 %v285_v44 }
 0x1ae   :  { %v282_v45 = vpop.f32.mrf.mxu2 }
 0x230   :  { %v360_v47 = vpop.f32.mrf.mxu3 }
 0x231   :  { %v361_v48 = vadd.f32 %v360_v47, %v302_v46 }
 0x233   :  { %v364_v49 = vpack.c.bf16 %v361_v48, %v361_v48 }
 0x235   :  { %365 = vst [vmem:[#allocation10] sm:$0xf] %v364_v49 }
 0x236   :  { %376 = dma.vmem_to_hbm [thread:$0]  %s372_s18, 64, %s374_s21, [#allocation4]  }
 0x238   :  { %v362_v50 = vpop.f32.mrf.mxu3 }
 0x239   :  { %649 = dma.done.wait [#allocation4], 64  }
 0x23a   :  { %650 = vsyncadd [#allocation4], 4294967232 }
 0x23b   :  { %381 = vsyncpa [#allocation3], 1 }
 0x23c   :  { %382 = vsyncpa [#allocation6], 1 }
 0x23d   :  { %383 = vsyncpa [#allocation9], 1 }
 0x23e   :  { %384 = vsyncpa [#allocation4], 1 }

</bundles_post_ra>
